<compile_context>
chip_gen: v6e
topology: v6e:2x2x1
jax: 0.10.0
libtpu: 0.0.40
codegen_flags: <defaults>
</compile_context>

<pallas_src>
import functools

import jax
import jax.numpy as jnp
from jax.experimental import pallas as pl
from jax.experimental.pallas import tpu as pltpu


def _round_up(x, m):
    return ((x + m - 1) // m) * m


# Tile-choice policy (shared by param prep and forward so they agree).
_N_SMALL_CAP, _N_BIG_TILE = 1024, 512   # class (lane) dimension
_K_SMALL_CAP, _K_BIG_TILE = 2048, 512   # d_common (contraction) dimension


def _choose_tile(padded_dim, small_cap, big_tile):
    return padded_dim if padded_dim <= small_cap else big_tile


def prepare_classifier_params(weight, bias, compute_dtype=jnp.float32):
    """One-time prep (outside the per-step jit path): transpose + zero-pad.

    weight: [class_number, d_common]  -> w_t: [k_pad, n_pad] in compute_dtype
    bias:   [class_number]            -> b_pad: [1, n_pad] in f32
    """
    class_number, d_common = weight.shape

    n_128 = _round_up(max(class_number, 128), 128)
    tn = _choose_tile(n_128, _N_SMALL_CAP, _N_BIG_TILE)
    n_pad = _round_up(n_128, tn)

    k_128 = _round_up(max(d_common, 128), 128)
    tk = _choose_tile(k_128, _K_SMALL_CAP, _K_BIG_TILE)
    k_pad = _round_up(k_128, tk)

    w_t = jnp.zeros((k_pad, n_pad), dtype=compute_dtype)
    w_t = w_t.at[:d_common, :class_number].set(weight.T.astype(compute_dtype))
    bias_pad = jnp.zeros((1, n_pad), dtype=jnp.float32)
    bias_pad = bias_pad.at[0, :class_number].set(bias.astype(jnp.float32))
    return w_t, bias_pad


def _classifier_kernel(x_ref, w_ref, b_ref, o_ref, acc_ref):
    # x_ref: [tb, tk]   batch x contraction tile (compute dtype)
    # w_ref: [tk, tn]   pre-transposed weight tile (compute dtype)
    # b_ref: [1,  tn]   bias tile (f32)
    # o_ref: [tb, tn]   lane-dense output tile
    # acc_ref: [tb, tn] f32 accumulator (persists across the K grid axis)
    k = pl.program_id(2)

    @pl.when(k == 0)
    def _():
        acc_ref[...] = jnp.zeros_like(acc_ref)

    acc_ref[...] += jnp.dot(x_ref[...], w_ref[...],
                            preferred_element_type=jnp.float32)

    @pl.when(k == pl.num_programs(2) - 1)
    def _():
        y = acc_ref[...] + b_ref[...]
        # LeakyReLU(0.2): max(y, 0.2*y) is exact for slope < 1.
        o_ref[...] = jnp.maximum(y, 0.2 * y).astype(o_ref.dtype)


@functools.partial(jax.jit, static_argnames=("class_number", "tile_b"))
def classifier_forward(x, w_t, bias_pad, *, class_number, tile_b=256):
    """x: [B, d_common]; w_t / bias_pad from prepare_classifier_params."""
    B, d_common = x.shape
    k_pad, n_pad = w_t.shape
    compute_dtype = w_t.dtype
    out_dtype = x.dtype

    tn = _choose_tile(n_pad, _N_SMALL_CAP, _N_BIG_TILE)
    tk = _choose_tile(k_pad, _K_SMALL_CAP, _K_BIG_TILE)

    # Sublane-packed batch tile (bf16 packs 2 rows / sublane).
    sublane = 16 if compute_dtype == jnp.bfloat16 else 8
    tb = _round_up(B, sublane) if B <= tile_b else tile_b
    b_padded = _round_up(B, tb)

    x = x.astype(compute_dtype)
    pad_b, pad_k = b_padded - B, k_pad - d_common
    if pad_b or pad_k:
        x = jnp.pad(x, ((0, pad_b), (0, pad_k)))

    grid = (b_padded // tb, n_pad // tn, k_pad // tk)

    cbytes = jnp.dtype(compute_dtype).itemsize
    obytes = jnp.dtype(out_dtype).itemsize

    # Double-buffered tiles (x, W, bias, out) + f32 accumulator scratch.
    vmem_needed = (2 * tb * tk * cbytes
                   + 2 * tk * tn * cbytes
                   + 2 * tn * 4
                   + 2 * tb * tn * obytes
                   + tb * tn * 4)
    vmem_limit = int(min(max(2 * vmem_needed, 4 << 20), 64 << 20))

    cost = pl.CostEstimate(
        flops=2 * b_padded * k_pad * n_pad,
        transcendentals=0,
        bytes_accessed=(b_padded * k_pad * cbytes + k_pad * n_pad * cbytes
                        + n_pad * 4 + b_padded * n_pad * obytes),
    )

    out_padded = pl.pallas_call(
        _classifier_kernel,
        out_shape=jax.ShapeDtypeStruct((b_padded, n_pad), out_dtype),
        grid=grid,
        in_specs=[
            pl.BlockSpec((tb, tk), lambda i, j, k: (i, k)),    # x tile
            pl.BlockSpec((tk, tn), lambda i, j, k: (k, j)),    # W^T tile
            pl.BlockSpec((1, tn), lambda i, j, k: (0, j)),     # bias tile
        ],
        out_specs=pl.BlockSpec((tb, tn), lambda i, j, k: (i, j)),
        scratch_shapes=[pltpu.VMEM((tb, tn), jnp.float32)],
        compiler_params=pltpu.CompilerParams(
            dimension_semantics=("parallel", "parallel", "arbitrary"),
            vmem_limit_bytes=vmem_limit,
        ),
        cost_estimate=cost,
    )(x, w_t, bias_pad)

    # Slice away batch + class padding outside the kernel.
    return out_padded[:B, :class_number]


def _ref_forward(x, weight, bias):
    y = x @ weight.T + bias
    return jnp.where(y >= 0, y, 0.2 * y)


if __name__ == "__main__":
    # Small shapes consistent with the module's forward: x is [batch, d_common].
    B, d_common, class_number = 8, 32, 10

    key = jax.random.PRNGKey(0)
    kx, kw, kb = jax.random.split(key, 3)

    # Deterministic parameter init, matching nn.init.normal_(std=0.01).
    weight = 0.01 * jax.random.normal(kw, (class_number, d_common), dtype=jnp.float32)
    bias = 0.01 * jax.random.normal(kb, (class_number,), dtype=jnp.float32)
    x = jax.random.normal(kx, (B, d_common), dtype=jnp.float32)

    ref = _ref_forward(x, weight, bias)

    # ---- f32 compute path --------------------------------------------------
    w_t32, b_p32 = prepare_classifier_params(weight, bias, jnp.float32)
    out32 = jax.block_until_ready(
        classifier_forward(x, w_t32, b_p32, class_number=class_number))
    assert out32.shape == (B, class_number)
    assert jnp.allclose(out32, ref, atol=1e-5, rtol=1e-5)

    # ---- bf16 compute path (f32 accumulation) -------------------------------
    w_t16, b_p16 = prepare_classifier_params(weight, bias, jnp.bfloat16)
    out16 = jax.block_until_ready(
        classifier_forward(x, w_t16, b_p16, class_number=class_number))
    assert out16.shape == (B, class_number)
    assert jnp.allclose(out16, ref, atol=5e-3, rtol=5e-2)

    # ---- unaligned shapes: exercise B/K/N padding + tiling ------------------
    B2, d2, n2 = 70, 200, 37
    k2x, k2w, k2b = jax.random.split(jax.random.PRNGKey(1), 3)
    w2 = 0.01 * jax.random.normal(k2w, (n2, d2), dtype=jnp.float32)
    bb2 = 0.01 * jax.random.normal(k2b, (n2,), dtype=jnp.float32)
    x2 = jax.random.normal(k2x, (B2, d2), dtype=jnp.float32)
    ref2 = _ref_forward(x2, w2, bb2)
    w2t, b2p = prepare_classifier_params(w2, bb2, jnp.float32)
    out2 = jax.block_until_ready(
        classifier_forward(x2, w2t, b2p, class_number=n2))
    assert out2.shape == (B2, n2)
    assert jnp.allclose(out2, ref2, atol=1e-4, rtol=1e-4)

    print("KERNEL_OK")
</pallas_src>

<mosaic_0001>
module attributes {stable_mosaic.version = 11 : i64} {
  func.func @_classifier_kernel(%arg0: i32, %arg1: i32, %arg2: i32, %arg3: memref<8x128xf32, #tpu.memory_space<vmem>>, %arg4: memref<128x128xf32, #tpu.memory_space<vmem>>, %arg5: memref<1x128xf32, #tpu.memory_space<vmem>>, %arg6: memref<8x128xf32, #tpu.memory_space<vmem>>, %arg7: memref<8x128xf32, #tpu.memory_space<vmem>>) attributes {dimension_semantics = [#tpu.dimension_semantics<parallel>, #tpu.dimension_semantics<parallel>, #tpu.dimension_semantics<arbitrary>], iteration_bounds = array<i64: 1, 1, 1>, scalar_prefetch = 0 : i64, scratch_operands = 1 : i64, tpu.core_type = #tpu.core_type<tc>, window_params = [{transform_indices = @transform_0, window_bounds = array<i64: 8, 128>}, {transform_indices = @transform_1, window_bounds = array<i64: 128, 128>}, {transform_indices = @transform_2, window_bounds = array<i64: 1, 128>}, {transform_indices = @transform_3, window_bounds = array<i64: 8, 128>}]} {
    %c0_i32 = arith.constant 0 : i32
    %0 = arith.cmpi eq, %arg2, %c0_i32 : i32
    %1 = arith.extui %0 : i1 to i32
    %c0_i32_0 = arith.constant 0 : i32
    %2 = arith.cmpi ne, %1, %c0_i32_0 : i32
    scf.if %2 {
      %cst_10 = arith.constant 0.000000e+00 : f32
      %12 = vector.broadcast %cst_10 : f32 to vector<8x128xf32>
      %c0_11 = arith.constant 0 : index
      %c0_12 = arith.constant 0 : index
      %13 = vector.load %arg7[%c0_11, %c0_12] : memref<8x128xf32, #tpu.memory_space<vmem>>, vector<8x128xf32>
      tpu.vector_store %arg7[%c0_11, %c0_12], %12 {strides = array<i32>} : memref<8x128xf32, #tpu.memory_space<vmem>>, vector<8x128xf32>,
    } else {
    }
    %c0 = arith.constant 0 : index
    %c0_1 = arith.constant 0 : index
    %3 = vector.load %arg7[%c0, %c0_1] : memref<8x128xf32, #tpu.memory_space<vmem>>, vector<8x128xf32>
    %c0_2 = arith.constant 0 : index
    %c0_3 = arith.constant 0 : index
    %4 = vector.load %arg3[%c0_2, %c0_3] : memref<8x128xf32, #tpu.memory_space<vmem>>, vector<8x128xf32>
    %c0_4 = arith.constant 0 : index
    %c0_5 = arith.constant 0 : index
    %5 = vector.load %arg4[%c0_4, %c0_5] : memref<128x128xf32, #tpu.memory_space<vmem>>, vector<128x128xf32>
    %cst = arith.constant dense<0.000000e+00> : vector<8x128xf32>
    %6 = tpu.matmul %4, %5, %cst {dimension_numbers = #tpu.dot_dimension_numbers<[1], [0], [0], [1], [0, 0, 1, 1], [], []>} : vector<8x128xf32>, vector<128x128xf32>, vector<8x128xf32> -> vector<8x128xf32>
    %7 = arith.addf %3, %6 : vector<8x128xf32>
    %c0_6 = arith.constant 0 : index
    %c0_7 = arith.constant 0 : index
    %8 = vector.load %arg7[%c0_6, %c0_7] : memref<8x128xf32, #tpu.memory_space<vmem>>, vector<8x128xf32>
    tpu.vector_store %arg7[%c0_6, %c0_7], %7 {strides = array<i32>} : memref<8x128xf32, #tpu.memory_space<vmem>>, vector<8x128xf32>,
    %c0_i32_8 = arith.constant 0 : i32
    %9 = arith.cmpi eq, %arg2, %c0_i32_8 : i32
    %10 = arith.extui %9 : i1 to i32
    %c0_i32_9 = arith.constant 0 : i32
    %11 = arith.cmpi ne, %10, %c0_i32_9 : i32
    scf.if %11 {
      %c0_10 = arith.constant 0 : index
      %c0_11 = arith.constant 0 : index
      %12 = vector.load %arg7[%c0_10, %c0_11] : memref<8x128xf32, #tpu.memory_space<vmem>>, vector<8x128xf32>
      %c0_12 = arith.constant 0 : index
      %c0_13 = arith.constant 0 : index
      %13 = vector.load %arg5[%c0_12, %c0_13] : memref<1x128xf32, #tpu.memory_space<vmem>>, vector<1x128xf32>
      %14 = vector.broadcast %13 : vector<1x128xf32> to vector<8x128xf32>
      %15 = arith.addf %12, %14 : vector<8x128xf32>
      %cst_14 = arith.constant 2.000000e-01 : f32
      %16 = vector.broadcast %cst_14 : f32 to vector<8x128xf32>
      %17 = arith.mulf %16, %15 : vector<8x128xf32>
      %18 = arith.maximumf %15, %17 : vector<8x128xf32>
      %c0_15 = arith.constant 0 : index
      %c0_16 = arith.constant 0 : index
      %19 = vector.load %arg6[%c0_15, %c0_16] : memref<8x128xf32, #tpu.memory_space<vmem>>, vector<8x128xf32>
      tpu.vector_store %arg6[%c0_15, %c0_16], %18 {strides = array<i32>} : memref<8x128xf32, #tpu.memory_space<vmem>>, vector<8x128xf32>,
    } else {
    }
    return
  }
  func.func @transform_0(%arg0: i32, %arg1: i32, %arg2: i32) -> (i32, i32) {
    %c0_i32 = arith.constant 0 : i32
    return %arg0, %arg2 : i32, i32
  }
  func.func @transform_1(%arg0: i32, %arg1: i32, %arg2: i32) -> (i32, i32) {
    %c0_i32 = arith.constant 0 : i32
    return %arg2, %arg1 : i32, i32
  }
  func.func @transform_2(%arg0: i32, %arg1: i32, %arg2: i32) -> (i32, i32) {
    %c0_i32 = arith.constant 0 : i32
    %c0_i32_0 = arith.constant 0 : i32
    return %c0_i32, %arg1 : i32, i32
  }
  func.func @transform_3(%arg0: i32, %arg1: i32, %arg2: i32) -> (i32, i32) {
    %c0_i32 = arith.constant 0 : i32
    return %arg0, %arg1 : i32, i32
  }
}

</mosaic_0001>

<bundles_post_ra>
// kernel: classifier_forward.1
= control target key start
LH: loop header
LB: loop body
LE: loop exit
PB: predicated region body
PF: predicated region fallthrough
CT: control target
= control target key end

     0   :  { %8 = vsyncpa [#allocation4], 0  ;;  %s295_s0 = inlined_call_operand.vmem [shape: f32[8,128], index: 0, kind: input, shape index: {}]   ;;  %s296_s1 = inlined_call_operand.hbm [shape: f32[128,128], index: 1, kind: input, shape index: {}]   ;;  %s297_s2 = inlined_call_operand.vmem [shape: f32[1,128], index: 2, kind: input, shape index: {}]   ;;  %s298_s3 = inlined_call_operand.hbm [shape: f32[8,128], index: 3, kind: output, shape index: {}]  }
   0x1   :  { %9 = vsyncpa [#allocation5], 0  ;;  %s257_s12 = smov [#allocation3]  }
   0x2   :  { %s17_s13 = sshll.u32 %s257_s12, 4  ;;  %s18_s13 = int_to_ptr.vmem [resolvable:$true] %s17_s13 }
   0x3   :  { %s221_s14 = scalar_lea.vmem %s18_s13, 2048  ;;  %p226_p1 = scmp.lt.s32.totalorder %s18_s13, %s18_s13 }
   0x4   :  { %p222_p0 = scmp.ne.s32.totalorder %s18_s13, %s221_s14  ;;  %p227_p2 = scmp.lt.s32.totalorder %s221_s14, %s221_s14 }
   0x6   :  { %p228_p3 = por %p227_p2, %p226_p1 }
   0x8   :  { %p229_p4 = pnand %p228_p3, %p222_p0 }
   0xa   :  { %232 = shalt.err (!%p229_p4)
}
   0xb   :  { %s258_s15 = smov 128   ;;  %s259_s16 = smov 8  }
   0xc   :  { %23 = dma.hbm_to_vmem [thread:$0]  %s296_s1, 2048, %s18_s13, [#allocation4], %s258_s15, %s258_s15, %s259_s16  }
   0xd   :  { %253 = dma.done.wait [#allocation4], 2048  }
   0xe   :  { %254 = vsyncadd [#allocation4], 4294965248  ;;  %v260_v0 = vmov 0.0   ;;  %vm261_vm0 = vmmov 0   ;;  %v51_v1 = vld [vmem:[#allocation3 + $0x78] sm:$0xff]  ;;  %v50_v2 = vld [vmem:[#allocation3 + $0x70] sm:$0xff] }
   0xf   :  { %172 = vmatprep.subr.mxu0 %v260_v0  ;;  %204 = vmatprep.mubr.msk.f32.mxu0 %vm261_vm0, %v260_v0  ;;  %v49_v3 = vld [vmem:[#allocation3 + $0x68] sm:$0xff]  ;;  %v48_v4 = vld [vmem:[#allocation3 + $0x60] sm:$0xff]  ;;  %v47_v5 = vld [vmem:[#allocation3 + $0x58] sm:$0xff]  ;;  %s262_s22 = smov [#allocation6]  }
  0x10   :  { %173 = vmatpush3.msra.mxu0 %v51_v1  ;;  %v46_v6 = vld [vmem:[#allocation3 + $0x50] sm:$0xff]  ;;  %v45_v7 = vld [vmem:[#allocation3 + $0x48] sm:$0xff]  ;;  %v44_v8 = vld [vmem:[#allocation3 + $0x40] sm:$0xff]  ;;  %s145_s23 = sshll.u32 %s262_s22, 4  ;;  %s146_s23 = int_to_ptr.vmem [resolvable:$true] %s145_s23 }
  0x11   :  { %174 = vmatprep.subr.mxu0 %v260_v0  ;;  %v43_v9 = vld [vmem:[#allocation3 + $0x38] sm:$0xff]  ;;  %v42_v10 = vld [vmem:[#allocation3 + $0x30] sm:$0xff]  ;;  %v41_v11 = vld [vmem:[#allocation3 + $0x28] sm:$0xff]  ;;  %s233_s24 = scalar_lea.vmem %s146_s23, 128  ;;  %p238_p6 = scmp.lt.s32.totalorder %s146_s23, %s146_s23 }
  0x12   :  { %175 = vmatpush3.msra.mxu0 %v50_v2  ;;  %v40_v12 = vld [vmem:[#allocation3 + $0x20] sm:$0xff]  ;;  %v39_v13 = vld [vmem:[#allocation3 + $0x18] sm:$0xff]  ;;  %v38_v14 = vld [vmem:[#allocation3 + $0x10] sm:$0xff]  ;;  %p234_p5 = scmp.ne.s32.totalorder %s146_s23, %s233_s24  ;;  %p239_p7 = scmp.lt.s32.totalorder %s233_s24, %s233_s24 }
  0x13   :  { %176 = vmatprep.subr.mxu0 %v260_v0  ;;  %v37_v15 = vld [vmem:[#allocation3 + $0x8] sm:$0xff]  ;;  %v36_v16 = vld [vmem:[#allocation3] sm:$0xff] }
  0x14   :  { %177 = vmatpush3.msra.mxu0 %v49_v3  ;;  %v35_v17 = vld [vmem:[%s295_s0] sm:$0xff]  ;;  %p240_p8 = por %p239_p7, %p238_p6 }
  0x15   :  { %178 = vmatprep.subr.mxu0 %v260_v0  ;;  %v154_v18 = vld [vmem:[%s297_s2] ss:$0 sm:$0xff] }
  0x16   :  { %179 = vmatpush3.msra.mxu0 %v48_v4  ;;  %p241_p9 = pnand %p240_p8, %p234_p5 }
  0x17   :  { %180 = vmatprep.subr.mxu0 %v260_v0 }
  0x18   :  { %181 = vmatpush3.msra.mxu0 %v47_v5 }
  0x19   :  { %182 = vmatprep.subr.mxu0 %v260_v0 }
  0x1a   :  { %183 = vmatpush3.msra.mxu0 %v46_v6 }
  0x1b   :  { %184 = vmatprep.subr.mxu0 %v260_v0 }
  0x1c   :  { %185 = vmatpush3.msra.mxu0 %v45_v7 }
  0x1d   :  { %186 = vmatprep.subr.mxu0 %v260_v0 }
  0x1e   :  { %187 = vmatpush3.msra.mxu0 %v44_v8 }
  0x1f   :  { %188 = vmatprep.subr.mxu0 %v260_v0 }
  0x20   :  { %189 = vmatpush3.msra.mxu0 %v43_v9 }
  0x21   :  { %190 = vmatprep.subr.mxu0 %v260_v0 }
  0x22   :  { %191 = vmatpush3.msra.mxu0 %v42_v10 }
  0x23   :  { %192 = vmatprep.subr.mxu0 %v260_v0 }
  0x24   :  { %193 = vmatpush3.msra.mxu0 %v41_v11 }
  0x25   :  { %194 = vmatprep.subr.mxu0 %v260_v0 }
  0x26   :  { %195 = vmatpush3.msra.mxu0 %v40_v12 }
  0x27   :  { %196 = vmatprep.subr.mxu0 %v260_v0 }
  0x28   :  { %197 = vmatpush3.msra.mxu0 %v39_v13 }
  0x29   :  { %198 = vmatprep.subr.mxu0 %v260_v0 }
  0x2a   :  { %199 = vmatpush3.msra.mxu0 %v38_v14 }
  0x2b   :  { %200 = vmatprep.subr.mxu0 %v260_v0 }
  0x2c   :  { %201 = vmatpush3.msra.mxu0 %v37_v15 }
  0x2d   :  { %202 = vmatprep.subr.mxu0 %v260_v0 }
  0x2e   :  { %203 = vmatpush3.msra.mxu0 %v36_v16 }
  0x2f   :  { %205 = vmatmul.mubr.f32.vlgmr.msra.gmra.mxu0 %v35_v17 }
  0xef   :  { %v118_v19 = vpop.f32.mrf.mxu0 }
  0xf0   :  { %v135_v20 = vadd.f32 %v154_v18, %v118_v19 }
  0xf1   :  { %v206_v21 = vpop.f32.mrf.mxu0 }
  0xf2   :  { %v136_v22 = vmul.f32 0.2, %v135_v20 }
  0xf4   :  { %v137_v23 = vmax.f32 %v135_v20, %v136_v22 }
  0xf6   :  { %138 = vst [vmem:[#allocation6] sm:$0xff] %v137_v23 }
  0xf7   :  { %244 = shalt.err (!%p241_p9)
}
  0xf8   :  { %148 = dma.vmem_to_hbm [thread:$0]  %s146_s23, 128, %s298_s3, [#allocation5]  }
  0xf9   :  { %255 = dma.done.wait [#allocation5], 128  }
  0xfa   :  { %256 = vsyncadd [#allocation5], 4294967168 }
  0xfb   :  { %152 = vsyncpa [#allocation4], 1 }
  0xfc   :  { %153 = vsyncpa [#allocation5], 1 }

</bundles_post_ra>
